<compile_context>
chip_gen: v5e
topology: v5e:2x2
jax: 0.10.0
libtpu: 0.0.40
codegen_flags: <defaults>
</compile_context>

<pallas_src>
import jax
import jax.numpy as jnp
from jax.experimental import pallas as pl
from jax.experimental.pallas import tpu as pltpu

_LANES = 128
_SUBLANES = 8


def _default_block_bytes() -> int:
    """Per-input-buffer byte budget, keyed on TPU generation."""
    try:
        kind = jax.devices()[0].device_kind.lower()
    except Exception:
        kind = ""
    if "v7" in kind:
        # 3.2 TB/s HBM: 4 MiB blocks keep the ~0.35us/step overhead <10%.
        # 2 x 4 MiB double buffer + 4 KiB partials is far under the 32 MiB
        # scoped-VMEM default.
        return 4 * 1024 * 1024
    # v5e / v6e: 2 MiB blocks (~1.6-2.4 us/step DMA) amortize step overhead
    # while staying well under even v5e's 16 MiB scoped-VMEM default.
    return 2 * 1024 * 1024


def _make_block_sum_kernel(rows_total: int, block_rows: int, needs_mask: bool):
    """Kernel: per-block partial sum of a (rows_total, 128) slab into (8, 128)."""
    folds = block_rows // _SUBLANES

    def fold(tile_f32):
        # (block_rows,128) -> (folds,8,128) is layout-preserving (last two dims
        # stay (8,128)); the axis-0 reduce is element-wise vreg adds on the VPU,
        # with no cross-lane/sublane work and no scratch accumulator traffic.
        return tile_f32.reshape(folds, _SUBLANES, _LANES).sum(axis=0)

    def kernel(x_ref, o_ref):
        if not needs_mask:
            o_ref[...] = fold(x_ref[...].astype(jnp.float32))
        else:
            i = pl.program_id(0)
            last = pl.num_programs(0) - 1

            # Hot path: unmasked load + fold for every block but the last.
            @pl.when(i != last)
            def _fast():
                o_ref[...] = fold(x_ref[...].astype(jnp.float32))

            # Cold path: Pallas edge-block padding is unspecified -> zero the
            # out-of-range rows before folding.
            @pl.when(i == last)
            def _edge():
                rows = i * block_rows + jax.lax.broadcasted_iota(
                    jnp.int32, (block_rows, _LANES), 0)
                tile = jnp.where(rows < rows_total,
                                 x_ref[...].astype(jnp.float32), 0.0)
                o_ref[...] = fold(tile)

    return kernel


def cos_loss(cos: jax.Array, *, block_bytes: int | None = None,
             min_pallas_bytes: int = 256 * 1024) -> jax.Array:
    """Pallas equivalent of cosLoss.forward: (1 - cos).sum() -> f32 scalar."""
    flat = jnp.ravel(cos)                      # free for contiguous inputs
    n = flat.shape[0]
    total = jnp.float32(n)                     # loss = N - sum(x)
    if n == 0:
        return total

    itemsize = flat.dtype.itemsize
    if block_bytes is None:
        block_bytes = _default_block_bytes()

    rows_total = n // _LANES
    # Small-input fallback: kernel launch + per-step fixed cost dominates tiny
    # inputs; XLA's fused reduction is faster and avoids a per-shape compile.
    if n * itemsize < min_pallas_bytes or rows_total < _SUBLANES:
        return total - jnp.sum(flat.astype(jnp.float32))

    # Lane remainder (n % 128 elements) handled in plain JAX: tiny, avoids
    # materializing a padded copy of the whole tensor in HBM.
    n_main = rows_total * _LANES
    if n_main < n:
        tail_sum = jnp.sum(flat[n_main:].astype(jnp.float32))
    else:
        tail_sum = jnp.float32(0.0)
    x2d = (flat if n_main == n else flat[:n_main]).reshape(rows_total, _LANES)

    # Byte-budgeted block size, (8,128)-aligned, clamped to the array extent.
    block_rows = max(_SUBLANES,
                     (block_bytes // (itemsize * _LANES)) // _SUBLANES * _SUBLANES)
    block_rows = min(block_rows, rows_total)
    block_rows = max(_SUBLANES, (block_rows // _SUBLANES) * _SUBLANES)

    num_blocks = pl.cdiv(rows_total, block_rows)
    needs_mask = (rows_total % block_rows) != 0

    kernel = _make_block_sum_kernel(rows_total, block_rows, needs_mask)

    cost = pl.CostEstimate(
        flops=n_main,
        transcendentals=0,
        bytes_accessed=n_main * itemsize + num_blocks * _SUBLANES * _LANES * 4,
    )

    # One (8,128) lane-dense partial per block; blocks are independent, so the
    # single grid axis is "parallel" (v7x megacore streams disjoint halves of
    # HBM; no-op on single-TensorCore v5e/v6e).
    partials = pl.pallas_call(
        kernel,
        out_shape=jax.ShapeDtypeStruct((num_blocks, _SUBLANES, _LANES), jnp.float32),
        grid_spec=pltpu.PrefetchScalarGridSpec(
            num_scalar_prefetch=0,
            grid=(num_blocks,),
            in_specs=[pl.BlockSpec((block_rows, _LANES), lambda i: (i, 0))],
            out_specs=pl.BlockSpec((None, _SUBLANES, _LANES), lambda i: (i, 0, 0)),
        ),
        compiler_params=pltpu.CompilerParams(
            dimension_semantics=("parallel",),
        ),
        cost_estimate=cost,
    )(x2d)

    # Final cross-lane reduce of num_blocks * 4 KiB partials is negligible.
    return total - (jnp.sum(partials) + tail_sum)


if __name__ == "__main__":
    def ref_loss(x):
        return jnp.sum(1.0 - x.astype(jnp.float32))

    key = jax.random.PRNGKey(0)
    k1, k2, k3, k4 = jax.random.split(key, 4)

    # Primary example implied by the module: per-pixel cosine map,
    # batch=2, channels=4, spatial=16x16.
    cos_small = jax.random.uniform(k1, (2, 4, 16, 16), jnp.float32, -1.0, 1.0)
    ref_small = ref_loss(cos_small)
    # Default path: small-input fallback (pure JAX).
    out_fb = jax.block_until_ready(cos_loss(cos_small))
    assert jnp.allclose(out_fb, ref_small, rtol=1e-5, atol=1e-3), (out_fb, ref_small)
    # Forced Pallas path at the module-implied shape (single full-extent block).
    out_kn = jax.block_until_ready(cos_loss(cos_small, min_pallas_bytes=0))
    assert jnp.allclose(out_kn, ref_small, rtol=1e-5, atol=1e-3), (out_kn, ref_small)

    # Larger lane-aligned f32 input -> default Pallas path.
    cos_big = jax.random.uniform(k2, (8, 4, 64, 64), jnp.float32, -1.0, 1.0)
    out_big = jax.block_until_ready(cos_loss(cos_big))
    assert jnp.allclose(out_big, ref_loss(cos_big), rtol=1e-5, atol=1e-2)

    # Odd total size with a small block budget: exercises the multi-block grid,
    # the gated edge-row mask, and the plain-JAX lane-remainder tail.
    cos_odd = jax.random.uniform(k3, (3, 7, 64, 65), jnp.float32, -1.0, 1.0)
    out_odd = jax.block_until_ready(cos_loss(cos_odd, block_bytes=64 * 1024))
    assert jnp.allclose(out_odd, ref_loss(cos_odd), rtol=1e-5, atol=1e-2)

    # bf16 input: exercises byte-based block sizing and the in-kernel f32 cast.
    cos_bf16 = jax.random.uniform(k4, (16, 8, 64, 64), jnp.bfloat16, -1.0, 1.0)
    out_bf16 = jax.block_until_ready(cos_loss(cos_bf16))
    assert jnp.allclose(out_bf16, ref_loss(cos_bf16), rtol=1e-5, atol=1e-1)

    print("KERNEL_OK")
</pallas_src>

<mosaic_0001>
module attributes {stable_mosaic.version = 11 : i64} {
  func.func @kernel(%arg0: i32, %arg1: memref<16x128xf32, #tpu.memory_space<vmem>>, %arg2: memref<1x8x128xf32, #tpu.memory_space<vmem>>) attributes {dimension_semantics = [#tpu.dimension_semantics<parallel>], iteration_bounds = array<i64: 1>, scalar_prefetch = 0 : i64, scratch_operands = 0 : i64, tpu.core_type = #tpu.core_type<tc>, window_params = [{transform_indices = @transform_0, window_bounds = array<i64: 16, 128>}, {transform_indices = @transform_1, window_bounds = array<i64: 1, 8, 128>}]} {
    %c0 = arith.constant 0 : index
    %c0_0 = arith.constant 0 : index
    %0 = vector.load %arg1[%c0, %c0_0] : memref<16x128xf32, #tpu.memory_space<vmem>>, vector<16x128xf32>
    %1 = vector.shape_cast %0 : vector<16x128xf32> to vector<2x8x128xf32>
    %cst = arith.constant dense<0.000000e+00> : vector<8x128xf32>
    %2 = vector.multi_reduction <add>, %1, %cst [0] : vector<2x8x128xf32> to vector<8x128xf32>
    %c0_1 = arith.constant 0 : index
    %c0_2 = arith.constant 0 : index
    %c0_3 = arith.constant 0 : index
    %3 = vector.load %arg2[%c0_1, %c0_2, %c0_3] : memref<1x8x128xf32, #tpu.memory_space<vmem>>, vector<1x8x128xf32>
    %4 = vector.shape_cast %3 : vector<1x8x128xf32> to vector<8x128xf32>
    %5 = vector.shape_cast %2 : vector<8x128xf32> to vector<1x8x128xf32>
    tpu.vector_store %arg2[%c0_1, %c0_2, %c0_3], %5 {strides = array<i32>} : memref<1x8x128xf32, #tpu.memory_space<vmem>>, vector<1x8x128xf32>,
    return
  }
  func.func @transform_0(%arg0: i32) -> (i32, i32) {
    %c0_i32 = arith.constant 0 : i32
    %c0_i32_0 = arith.constant 0 : i32
    return %arg0, %c0_i32 : i32, i32
  }
  func.func @transform_1(%arg0: i32) -> (i32, i32, i32) {
    %c0_i32 = arith.constant 0 : i32
    %c0_i32_0 = arith.constant 0 : i32
    %c0_i32_1 = arith.constant 0 : i32
    return %arg0, %c0_i32, %c0_i32_0 : i32, i32, i32
  }
}

</mosaic_0001>

<bundles_post_ra>
// kernel: tpu_custom_call.1
= control target key start
LH: loop header
LB: loop body
LE: loop exit
PB: predicated region body
PF: predicated region fallthrough
CT: control target
= control target key end

     0   :  { %6 = vsyncpa [#allocation3], 0  ;;  %s122_s0 = inlined_call_operand.hbm [shape: f32[16,128], index: 0, kind: input, shape index: {}]   ;;  %s123_s1 = inlined_call_operand.hbm [shape: f32[1,8,128], index: 1, kind: output, shape index: {}]  }
   0x1   :  { %7 = vsyncpa [#allocation4], 0  ;;  %s12_s8 = sshll.u32 %s122_s0, 4  ;;  %s102_s9 = smov [#allocation2]   ;;  %s13_s8 = int_to_ptr.hbm [resolvable:$true] %s12_s8 }
   0x2   :  { %s14_s10 = sshll.u32 %s102_s9, 4  ;;  %s103_s11 = smov 128   ;;  %s15_s10 = int_to_ptr.vmem [resolvable:$true] %s14_s10 }
   0x3   :  { %s104_s12 = smov 8  }
   0x4   :  { %20 = dma.hbm_to_vmem [thread:$0]  %s13_s8, 256, %s15_s10, [#allocation3], %s103_s11, %s103_s11, %s104_s12  }
   0x5   :  { %98 = dma.done.wait [#allocation3], 256  }
   0x6   :  { %99 = vsyncadd [#allocation3], 4294967040  ;;  %s105_s13 = smov [#allocation5]   ;;  %s36_s17 = sshll.u32 %s123_s1, 4  ;;  %v25_v0 = vld [vmem:[#allocation2] sm:$0xff]  ;;  %v26_v1 = vld [vmem:[#allocation2 + $0x8] sm:$0xff]  ;;  %s37_s17 = int_to_ptr.hbm [resolvable:$true] %s36_s17 }
   0x7   :  { %s34_s14 = sshll.u32 %s105_s13, 4  ;;  %v27_v2 = vadd.f32 %v26_v1, %v25_v0  ;;  %s35_s14 = int_to_ptr.vmem [resolvable:$true] %s34_s14 }
   0x9   :  { %28 = vst [vmem:[#allocation5] sm:$0xff] %v27_v2 }
   0xa   :  { %39 = dma.vmem_to_hbm [thread:$0]  %s35_s14, 128, %s37_s17, [#allocation4]  }
   0xb   :  { %100 = dma.done.wait [#allocation4], 128  }
   0xc   :  { %101 = vsyncadd [#allocation4], 4294967168 }
   0xd   :  { %44 = vsyncpa [#allocation3], 1 }
   0xe   :  { %45 = vsyncpa [#allocation4], 1 }

</bundles_post_ra>
